<compile_context>
chip_gen: v7x
topology: tpu7x:2x2x1
jax: 0.10.0
libtpu: 0.0.40
codegen_flags: <defaults>
</compile_context>

<pallas_src>
import jax
import jax.numpy as jnp
from jax.experimental import pallas as pl
from jax.experimental.pallas import tpu as pltpu

_LANE = 128


def _outconv_kernel(x_ref, w_ref, b_ref, o_ref):
    # x_ref: (TB, Cin, TL)  w_ref: (Cout, Cin)  b_ref: (Cout, 1)
    # o_ref: (TB, Cout, TL)
    w = w_ref[...]
    b = b_ref[...]
    for i in range(x_ref.shape[0]):  # static unroll over the small batch tile
        acc = jnp.dot(w, x_ref[i], preferred_element_type=jnp.float32)
        o_ref[i] = (acc + b).astype(o_ref.dtype)  # bias broadcasts over lanes


def _round_down(x, m):
    return (x // m) * m


def _round_up(x, m):
    return ((x + m - 1) // m) * m


def _largest_divisor_at_most(n, cap):
    cap = max(1, min(n, cap))
    for d in range(cap, 0, -1):
        if n % d == 0:
            return d
    return 1


def _choose_tiles(N, Cin, Cout, L, *, lane_cap=8192,
                  tile_budget_bytes=8 * 1024 * 1024, max_tb=8):
    """Pick (TB, TL): batch-tile and lane-dense length-tile sizes.

    TL is a multiple of 128 (or == L when L < 128) and bounded so that the
    double-buffered x + out tiles stay well inside every generation's scoped
    VMEM default (16 MiB v5e / 32 MiB v6e / 32 MiB v7x).
    """
    bytes_per_lane = 2 * (Cin + Cout) * 4  # double-buffered f32 x + out tiles
    budget_cap = max(_LANE, _round_down(tile_budget_bytes // bytes_per_lane, _LANE))

    if L < _LANE:
        # Only legal sub-128 tile is the full dim (lane-masked stores, but
        # the whole L fits in a handful of vregs anyway).
        TL = L
    else:
        TL = min(_round_down(L, _LANE), lane_cap, budget_cap)
        # v7x has 2 TensorCores sharing HBM: with a single batch row make
        # sure the 'parallel' L axis still has >= 2 grid steps.
        if N == 1 and pl.cdiv(L, TL) < 2 and TL >= 2 * _LANE:
            TL = _round_up(pl.cdiv(TL, 2), _LANE)

    n_l = pl.cdiv(L, TL)

    # Short-L inputs: block the batch axis so each step carries a wider
    # read/write footprint (amortizes ~0.35 us/step), but keep >= 2 grid
    # steps when there is more than one batch row (v7x megacore).
    TB = 1
    if n_l == 1 and N > 1:
        target = min(max_tb,
                     max(1, 1024 // TL),
                     max(1, budget_cap // TL),
                     max(1, N // 2))
        TB = _largest_divisor_at_most(N, target)
    # TODO(synk): N == 1 and L < 128 still yields a single grid step; one v7x
    # TensorCore idles, but the problem is tiny so it is not worth splitting.

    return TB, TL, n_l


def out_conv(x, weight, bias):
    """Equivalent of nn.Conv1d(in_channels, out_channels, kernel_size=1)(x).

    x:      (N, C_in, L)   float32
    weight: (C_out, C_in, 1)
    bias:   (C_out,)
    returns (N, C_out, L)
    """
    N, Cin, L = x.shape
    Cout = weight.shape[0]

    w2 = weight[:, :, 0]         # (Cout, Cin) — tiny, no layout surgery
    b2 = bias.reshape(Cout, 1)   # (Cout, 1)   — broadcasts over L in-kernel

    TB, TL, n_l = _choose_tiles(N, Cin, Cout, L)
    n_b = N // TB                # TB is a divisor of N by construction

    cost = pl.CostEstimate(
        flops=2 * N * L * Cin * Cout,
        transcendentals=0,
        bytes_accessed=4 * (N * Cin * L + N * Cout * L + Cout * Cin + Cout),
    )

    return pl.pallas_call(
        _outconv_kernel,
        out_shape=jax.ShapeDtypeStruct((N, Cout, L), x.dtype),
        grid=(n_b, n_l),
        in_specs=[
            # channels on sublanes, L on lanes; batch blocked by TB.
            pl.BlockSpec((TB, Cin, TL), lambda n, l: (n, 0, l)),
            pl.BlockSpec((Cout, Cin), lambda n, l: (0, 0)),
            pl.BlockSpec((Cout, 1), lambda n, l: (0, 0)),
        ],
        out_specs=pl.BlockSpec((TB, Cout, TL), lambda n, l: (n, 0, l)),
        compiler_params=pltpu.CompilerParams(
            dimension_semantics=("parallel", "parallel"),
        ),
        cost_estimate=cost,
    )(x, w2, b2)


def reference_out_conv(x, weight, bias):
    # Pure-JAX reference (1x1 conv == per-position channel matmul).
    return jnp.einsum("ncl,oc->nol", x, weight[:, :, 0]) + bias[None, :, None]


if __name__ == "__main__":
    key = jax.random.PRNGKey(0)
    k_x, k_w, k_b = jax.random.split(key, 3)

    N, C_in, C_out, L = 2, 4, 3, 16

    x = jax.random.normal(k_x, (N, C_in, L), dtype=jnp.float32)
    # Deterministic init mimicking PyTorch Conv1d default uniform(-1/sqrt(fan_in), +).
    bound = 1.0 / jnp.sqrt(jnp.float32(C_in * 1))
    weight = jax.random.uniform(k_w, (C_out, C_in, 1), jnp.float32, -bound, bound)
    bias = jax.random.uniform(k_b, (C_out,), jnp.float32, -bound, bound)

    out = out_conv(x, weight, bias)
    out = jax.block_until_ready(out)

    ref = reference_out_conv(x, weight, bias)
    assert out.shape == (N, C_out, L), out.shape
    assert jnp.allclose(out, ref, atol=1e-5, rtol=1e-5), "mismatch vs reference"

    print("KERNEL_OK")
</pallas_src>

<mosaic_0001>
module attributes {stable_mosaic.version = 11 : i64} {
  func.func @_outconv_kernel(%arg0: i32, %arg1: i32, %arg2: memref<1x4x16xf32, #tpu.memory_space<vmem>>, %arg3: memref<3x4xf32, #tpu.memory_space<vmem>>, %arg4: memref<3x1xf32, #tpu.memory_space<vmem>>, %arg5: memref<1x3x16xf32, #tpu.memory_space<vmem>>) attributes {dimension_semantics = [#tpu.dimension_semantics<parallel>, #tpu.dimension_semantics<parallel>], iteration_bounds = array<i64: 2, 1>, scalar_prefetch = 0 : i64, scratch_operands = 0 : i64, tpu.core_type = #tpu.core_type<tc>, window_params = [{transform_indices = @transform_0, window_bounds = array<i64: 1, 4, 16>}, {pipeline_mode = #tpu.pipeline_mode<synchronous>, transform_indices = @transform_1, window_bounds = array<i64: 3, 4>}, {pipeline_mode = #tpu.pipeline_mode<synchronous>, transform_indices = @transform_2, window_bounds = array<i64: 3, 1>}, {transform_indices = @transform_3, window_bounds = array<i64: 1, 3, 16>}]} {
    %c0 = arith.constant 0 : index
    %c0_0 = arith.constant 0 : index
    %0 = vector.load %arg3[%c0, %c0_0] : memref<3x4xf32, #tpu.memory_space<vmem>>, vector<3x4xf32>
    %c0_1 = arith.constant 0 : index
    %c0_2 = arith.constant 0 : index
    %1 = vector.load %arg4[%c0_1, %c0_2] : memref<3x1xf32, #tpu.memory_space<vmem>>, vector<3x1xf32>
    %c0_3 = arith.constant 0 : index
    %c0_4 = arith.constant 0 : index
    %c0_5 = arith.constant 0 : index
    %2 = vector.load %arg2[%c0_3, %c0_4, %c0_5] : memref<1x4x16xf32, #tpu.memory_space<vmem>>, vector<1x4x16xf32>
    %3 = vector.shape_cast %2 : vector<1x4x16xf32> to vector<4x16xf32>
    %cst = arith.constant dense<0.000000e+00> : vector<3x16xf32>
    %4 = tpu.matmul %0, %3, %cst {dimension_numbers = #tpu.dot_dimension_numbers<[1], [0], [0], [1], [0, 0, 1, 1], [], []>} : vector<3x4xf32>, vector<4x16xf32>, vector<3x16xf32> -> vector<3x16xf32>
    %5 = vector.broadcast %1 : vector<3x1xf32> to vector<3x16xf32>
    %6 = arith.addf %4, %5 : vector<3x16xf32>
    %c0_6 = arith.constant 0 : index
    %c0_7 = arith.constant 0 : index
    %c0_8 = arith.constant 0 : index
    %7 = vector.load %arg5[%c0_6, %c0_7, %c0_8] : memref<1x3x16xf32, #tpu.memory_space<vmem>>, vector<1x3x16xf32>
    %8 = vector.shape_cast %7 : vector<1x3x16xf32> to vector<3x16xf32>
    %9 = vector.shape_cast %6 : vector<3x16xf32> to vector<1x3x16xf32>
    tpu.vector_store %arg5[%c0_6, %c0_7, %c0_8], %9 {strides = array<i32>} : memref<1x3x16xf32, #tpu.memory_space<vmem>>, vector<1x3x16xf32>,
    return
  }
  func.func @transform_0(%arg0: i32, %arg1: i32) -> (i32, i32, i32) {
    %c0_i32 = arith.constant 0 : i32
    %c0_i32_0 = arith.constant 0 : i32
    return %arg0, %c0_i32, %arg1 : i32, i32, i32
  }
  func.func @transform_1(%arg0: i32, %arg1: i32) -> (i32, i32) {
    %c0_i32 = arith.constant 0 : i32
    %c0_i32_0 = arith.constant 0 : i32
    %c0_i32_1 = arith.constant 0 : i32
    return %c0_i32, %c0_i32_0 : i32, i32
  }
  func.func @transform_2(%arg0: i32, %arg1: i32) -> (i32, i32) {
    %c0_i32 = arith.constant 0 : i32
    %c0_i32_0 = arith.constant 0 : i32
    %c0_i32_1 = arith.constant 0 : i32
    return %c0_i32, %c0_i32_0 : i32, i32
  }
  func.func @transform_3(%arg0: i32, %arg1: i32) -> (i32, i32, i32) {
    %c0_i32 = arith.constant 0 : i32
    %c0_i32_0 = arith.constant 0 : i32
    return %arg0, %c0_i32, %arg1 : i32, i32, i32
  }
}

</mosaic_0001>

<bundles_post_ra>
// kernel: tpu_custom_call.1
= control target key start
LH: loop header
LB: loop body
LE: loop exit
PB: predicated region body
PF: predicated region fallthrough
CT: control target
= control target key end

     0   :  { %8 = vsyncpa [#allocation3], 0  ;;  %s697_s0 = inlined_call_operand.hbm [shape: f32[2,4,16], index: 0, kind: input, shape index: {}]   ;;  %s698_s1 = inlined_call_operand.vmem [shape: f32[3,4], index: 1, kind: input, shape index: {}]   ;;  %s699_s2 = inlined_call_operand.vmem [shape: f32[3,1], index: 2, kind: input, shape index: {}]   ;;  %s700_s3 = inlined_call_operand.vmem [shape: f32[2,3,16], index: 3, kind: output, shape index: {}]  }
   0x1   :  { %10 = vsyncpa [#allocation3 + $0x1], 0  ;;  %s566_s12 = smov 0   ;;  %s568_s13 = smov 0  }
   0x2   :  { %s570_s14 = smov 0   ;;  %s572_s15 = smov 0  }
   0x3   :  { %s574_s16 = smov 0   ;;  %s576_s17 = smov 0  }
   0x4 LB: > { %s381_s18 = sadd.s32 4294967295, %s540_s17   ;;  %s28_s19 = sadd.s32 1, %s536_s16  ;;  %s540_s17 = sphi %s576_s17, %s16_s17   ;;  %s536_s16 = sphi %s574_s16, %s710_s16   ;;  %s532_s15 = sphi %s572_s15, %s709_s15   ;;  %s528_s14 = sphi %s570_s14, %s708_s14   ;;  %s524_s13 = sphi %s568_s13, %s707_s13   ;;  %s520_s12 = sphi %s566_s12, %s706_s12  }
   0x5   : > { %p30_p0 = scmp.ge.s32.totalorder %s28_s19, 2  ;;  %s37_s20 = sadd.s32 1, %s528_s14 }
   0x6   : > { %p44_p1 = scmp.ne.s32.totalorder %s528_s14, %s524_s13  ;;  %p45_p2 = scmp.eq.s32.totalorder %s540_s17, 0 }
   0x7   : > { %s712_s19 = smov (%p30_p0, %s28_s19), 0  ;;  %p50_p4 = scmp.ne.s32.totalorder %s524_s13, %s520_s12 }
   0x8   : > { %p602_p3 = por %p45_p2, %p44_p1  ;;  %s32_s22 = ssub.s32 %s536_s16, %s712_s19 }
   0x9   : > { %p51_p5 = scmp.eq.s32.totalorder %s381_s18, 0  ;;  %p35_p6 = scmp.eq.s32.totalorder %s32_s22, 0 }
   0xa   : > { %p407_p8 = scmp.lt.s32.totalorder %s540_s17, 2  ;;  %s150_s25 = sand.u32 1, %s528_s14  }
   0xb   : > { %p609_p7 = por %p51_p5, %p50_p4  ;;  %s386_s26 = sshll.u32 %s536_s16, 6 }
   0xc   : > { %s615_s24 = scalar_select %p35_p6, %s528_s14, %s37_s20  }
   0xd   : > { %s385_s27 = sshll.u32 %s150_s25, 2  ;;  %s622_s30 = scalar_lea.hbm %s697_s0, %s386_s26 }
   0xe   : > { %s154_s4 = scalar_lea.vmem [#allocation2], %s385_s27  ;;  %p626_p9 = pnand %p407_p8, %p602_p3 }
   0xf   : > { %s162_s5 = sshll.u32 %s154_s4, 4  ;;  %s151_s7 = scalar_lea.sflag [#allocation3], %s150_s25  ;;  %s630_s5 = int_to_ptr.vmem [resolvable:$true] %s162_s5 }
  0x10   : > { %s460_s8 = scalar_lea.hbm %s622_s30, 64  ;;  %p462_p13 = pneg %p626_p9 }
  0x11   : > { %p461_p12 = scmp.ne.s32.totalorder %s622_s30, %s460_s8  ;;  %s465_s11 = scalar_lea.hbm %s697_s0, 128 }
  0x12   : > { %p466_p2 = scmp.lt.u32.totalorder %s622_s30, %s697_s0  ;;  %p467_p3 = scmp.lt.u32.totalorder %s465_s11, %s460_s8 }
  0x13   : > { %p463_p0 = pnand %p462_p13, %p461_p12  ;;  %p469_p5 = scmp.lt.u32.totalorder %s460_s8, %s622_s30 }
  0x14   : > { %p468_p4 = por %p467_p3, %p466_p2 }
  0x15   : > { %p464_p1 = pneg %p463_p0 }
  0x16   : > { %p470_p6 = por %p469_p5, %p468_p4 }
  0x18   : > { %p471_p8 = pnand %p470_p6, %p464_p1 }
  0x1a   : > { %474 = shalt.err (!%p471_p8)
}
  0x1b   : > { %s475_s20 = scalar_lea.vmem %s630_s5, 64  ;;  %s542_s21 = smov [#allocation2]  }
  0x1c   : > { %p476_p12 = scmp.ne.s32.totalorder %s630_s5, %s475_s20  ;;  %s480_s22 = sshll.u32 %s542_s21, 4  ;;  %s481_s22 = int_to_ptr.vmem [resolvable:$false] %s480_s22 }
  0x1d   : > { %s482_s25 = scalar_lea.vmem %s481_s22, 128  ;;  %p483_p11 = scmp.lt.s32.totalorder %s630_s5, %s481_s22 }
  0x1e   : > { %p478_p0 = pnand %p476_p12, %p462_p13  ;;  %p484_p2 = scmp.lt.s32.totalorder %s482_s25, %s475_s20 }
  0x20   : > { %p479_p10 = pneg %p478_p0  ;;  %p485_p3 = por %p484_p2, %p483_p11 }
  0x22   : > { %p486_p4 = pnand %p485_p3, %p479_p10 }
  0x24   : > { %489 = shalt.err (!%p486_p4)
}
  0x25   : > { %406 = dma.hbm_to_vmem [thread:$0]  (!%p626_p9), %s622_s30, 64, %s630_s5, %s151_s7  }
  0x26   : > { %p704_p1 = scmp.lt.s32.totalorder %s540_s17, 3  ;;  %p705_p5 = scmp.ge.s32.totalorder %s540_s17, 1 }
  0x28   : > { %p168_p13 = pnand %p705_p5, %p704_p1 }
  0x29   : > { %s173_s26 = sand.u32 (!%p168_p13), 1, %s524_s13  }
  0x2a   : > { %171 = sbr.rel (%p168_p13) target bundleno = 268 (0x10c), region = 32  ;;  %s388_s27 = sshll.u32 (!%p168_p13), %s173_s26, 2 }
  0x2b   : > { %s174_s28 = scalar_lea.sflag (!%p168_p13), [#allocation3], %s173_s26  ;;  %s177_s29 = scalar_lea.vmem (!%p168_p13), [#allocation2], %s388_s27 }
  0x31   : > { %515 = dma.done.wait (%p609_p7), %s174_s28, 64  }
  0x32   : > { %517 = vsyncadd (%p609_p7), %s174_s28, 4294967232  ;;  %v543_v0 = vmov 0.0   ;;  %vm544_vm0 = vmmov 0   ;;  %v545_v1 = vmov 0   ;;  %vm221_vm1 = vcmask 1043456   ;;  %p202_p7 = scmp.lt.s32.totalorder %s532_s15, 1 }
  0x33   : > { %396 = vmatprep.subr.mxu0 %v543_v0  ;;  %398 = vmatprep.mubr.msk.f32.mxu0 %vm544_vm0, %v543_v0  ;;  %vm217_vm2 = vcmask 31744   ;;  %v211_v2 = vld [vmem:[%s177_s29] sm:$0xf]  ;;  %vm295_vm3 = vcmask 124928  }
  0x34   : > { %459 = vset.pattern.permute.xlu0 %v545_v1  ;;  %v209_v3 = vld [vmem:[%s698_s1] sm:$0x7]  ;;  %397 = vmatpush3.msk.msra.mxu0 %vm221_vm1, %v211_v2  ;;  %s714_s15 = smov (!%p202_p7, %s532_s15), 1 }
  0x35   : > { %v210_v4 = vld [vmem:[%s699_s2] sm:$0x7]  ;;  %399 = vmatmul.mubr.msk.f32.vlgmr.msra.gmra.mrb[0].mxu0 %vm217_vm2, %v209_v3  ;;  %s389_s23 = sshll.u32 %s714_s15, 2 }
  0x36   : > { %214 = vperm.xlu0 %459, %v210_v4   ;;  %s208_s9 = scalar_lea.vmem %s700_s3, %s389_s23 }
  0xb5   : > { %v215_v5 = vpop.permute.xlu0 %214 }
 0x108   : > { %v291_v6 = vpop.f32.mrb[0].mxu0 }
 0x109   : > { %v292_v7 = vadd.f32 %v291_v6, %v215_v5  ;;  %v400_v8 = vpop.f32.mrb[1].mxu0 }
 0x10b   : > { %296 = vst.msk [vmem:[%s208_s9] sm:$0x7] %vm295_vm3, %v292_v7 }
 0x10c PF: > { %s16_s17 = sadd.s32 1, %s540_s17   ;;  %s706_s12 = smov %s524_s13 }
 0x10d   : > { %p13_p9 = scmp.ge.s32.totalorder %s16_s17, 4   ;;  %s707_s13 = smov %s528_s14 }
 0x10e   : > { %s708_s14 = smov %s615_s24  ;;  %s709_s15 = smov %s536_s16 }
 0x10f   : > { %s710_s16 = smov %s712_s19  ;;  %15 = sbr.rel (!%p13_p9) target bundleno = 4 (0x4), region = 72 }
 0x116   :  { %322 = vsyncpa [#allocation3], 1 }
 0x117   :  { %324 = vsyncpa [#allocation3 + $0x1], 1 }

</bundles_post_ra>
